<compile_context>
chip_gen: v5e
topology: v5e:2x2
jax: 0.10.0
libtpu: 0.0.40
codegen_flags: <defaults>
</compile_context>

<pallas_src>
import functools

import jax
import jax.numpy as jnp
from jax import lax
from jax.experimental import pallas as pl
from jax.experimental.pallas import tpu as pltpu


def _round_up(x, m):
    return (x + m - 1) // m * m


def _fused_net_kernel(x_ref, w_ref, b_ref, o_ref, *, num_layers):
    """Fused multi-layer forward on one batch tile.

    x_ref: (TB, D)    activation tile (feature dim padded to lane-dense D)
    w_ref: (L, D, D)  stacked weights, pre-transposed to (in, out) layout
    b_ref: (L, 1, D)  stacked biases (zero-padded)
    o_ref: (TB, D)    output tile
    """
    h = x_ref[...].astype(jnp.float32)
    for l in range(num_layers):  # static unroll; L is tiny and known at trace time
        # torch.nn.functional.normalize(h, p=2, dim=1, eps=1e-12)
        sq = jnp.sum(h * h, axis=1, keepdims=True)              # (TB, 1)
        inv = lax.rsqrt(jnp.maximum(sq, 1e-24))                 # EUP; eps clamp kept
        h_dir = h * inv
        # MXU matmul, no transpose: W already (in, out)
        y = jnp.dot(h_dir, w_ref[l], preferred_element_type=jnp.float32)
        h = jnp.maximum(y + b_ref[l], 0.0)                      # +bias, ReLU
    o_ref[...] = h


def fused_net_forward(x, stacked_w, stacked_b, out_features):
    """x: (B, Fin) f32. stacked_w: (L, D, D). stacked_b: (L, 1, D).

    Returns (B, out_features) f32.
    """
    L, D, _ = stacked_w.shape
    B, Fin = x.shape

    # Batch tile: lane-dense feature dim is already D (multiple of 128);
    # keep TB modest so 2 bufs * (x + out) tiles + resident W/b fit easily
    # in VMEM on every generation (v7x: 64 MiB physical).
    TB = 256 if B >= 256 else _round_up(B, 8)
    B_pad = _round_up(B, TB)

    xp = jnp.zeros((B_pad, D), jnp.float32).at[:B, :Fin].set(
        x.astype(jnp.float32))

    grid = (B_pad // TB,)
    flops = 2 * B_pad * D * D * L
    bytes_accessed = 4 * (2 * B_pad * D + L * D * D + L * D)

    out = pl.pallas_call(
        functools.partial(_fused_net_kernel, num_layers=L),
        out_shape=jax.ShapeDtypeStruct((B_pad, D), jnp.float32),
        grid=grid,
        in_specs=[
            pl.BlockSpec((TB, D), lambda i: (i, 0)),          # x: tiled over batch
            pl.BlockSpec((L, D, D), lambda i: (0, 0, 0)),     # W: VMEM-resident
            pl.BlockSpec((L, 1, D), lambda i: (0, 0, 0)),     # b: VMEM-resident
        ],
        out_specs=pl.BlockSpec((TB, D), lambda i: (i, 0)),
        compiler_params=pltpu.CompilerParams(
            dimension_semantics=("parallel",),                # shard batch across TCs
            vmem_limit_bytes=32 * 1024 * 1024,
        ),
        cost_estimate=pl.CostEstimate(
            flops=flops,
            transcendentals=B_pad * L,
            bytes_accessed=bytes_accessed,
        ),
    )(xp, stacked_w, stacked_b)

    return out[:B, :out_features]


class Net:
    """JAX/Pallas equivalent of the PyTorch Net (forward path only)."""

    def __init__(self, dims, key):
        self.dims = list(dims)
        self.params = []
        for d in range(len(dims) - 1):
            key, kw, kb = jax.random.split(key, 3)
            fan_in, fan_out = dims[d], dims[d + 1]
            # Deterministic init mimicking nn.Linear's uniform(-1/sqrt(in), 1/sqrt(in))
            bound = 1.0 / (fan_in ** 0.5)
            w = jax.random.uniform(kw, (fan_out, fan_in), jnp.float32,
                                   minval=-bound, maxval=bound)
            b = jax.random.uniform(kb, (fan_out,), jnp.float32,
                                   minval=-bound, maxval=bound)
            self.params.append((w, b))

        # One-time host-side prep: pre-transpose to (in, out) and zero-pad all
        # feature dims to a common lane-dense D (multiple of 128), then stack.
        D = _round_up(max(self.dims), 128)
        L = len(self.params)
        ws = jnp.zeros((L, D, D), jnp.float32)
        bs = jnp.zeros((L, 1, D), jnp.float32)
        for l, (w, b) in enumerate(self.params):
            fout, fin = w.shape
            ws = ws.at[l, :fin, :fout].set(w.T)
            bs = bs.at[l, 0, :fout].set(b)
        self.stacked_w = ws
        self.stacked_b = bs
        self.padded_dim = D

    def forward(self, x):
        if x.ndim == 1:                      # matches the torch 1-D branch
            x = x[None, :]
        return fused_net_forward(x, self.stacked_w, self.stacked_b,
                                 self.dims[-1])


def _reference_forward(x, params):
    """Pure-jnp reference (torch semantics) for sanity checking."""
    if x.ndim == 1:
        x = x[None, :]
    for (w, b) in params:
        norm = jnp.sqrt(jnp.sum(x * x, axis=1, keepdims=True))
        xd = x / jnp.maximum(norm, 1e-12)
        x = jnp.maximum(xd @ w.T + b[None, :], 0.0)
    return x


if __name__ == "__main__":
    key = jax.random.PRNGKey(0)
    key, kx = jax.random.split(key)

    # Small shapes consistent with the module: dims = [32, 64, 32], batch = 8.
    dims = [32, 64, 32]
    batch = 8
    x = jax.random.normal(kx, (batch, dims[0]), dtype=jnp.float32)

    net = Net(dims, key)
    out = net.forward(x)
    out = jax.block_until_ready(out)

    ref = _reference_forward(x, net.params)
    assert out.shape == (batch, dims[-1])
    assert jnp.allclose(out, ref, atol=1e-4, rtol=1e-4), "mismatch vs reference"

    print("KERNEL_OK")
</pallas_src>

<mosaic_0001>
module attributes {stable_mosaic.version = 11 : i64} {
  func.func @_fused_net_kernel(%arg0: i32, %arg1: memref<8x128xf32, #tpu.memory_space<vmem>>, %arg2: memref<2x128x128xf32, #tpu.memory_space<vmem>>, %arg3: memref<2x1x128xf32, #tpu.memory_space<vmem>>, %arg4: memref<8x128xf32, #tpu.memory_space<vmem>>) attributes {dimension_semantics = [#tpu.dimension_semantics<parallel>], iteration_bounds = array<i64: 1>, scalar_prefetch = 0 : i64, scratch_operands = 0 : i64, tpu.core_type = #tpu.core_type<tc>, window_params = [{transform_indices = @transform_0, window_bounds = array<i64: 8, 128>}, {pipeline_mode = #tpu.pipeline_mode<synchronous>, transform_indices = @transform_1, window_bounds = array<i64: 2, 128, 128>}, {pipeline_mode = #tpu.pipeline_mode<synchronous>, transform_indices = @transform_2, window_bounds = array<i64: 2, 1, 128>}, {transform_indices = @transform_3, window_bounds = array<i64: 8, 128>}]} {
    %c0 = arith.constant 0 : index
    %c0_0 = arith.constant 0 : index
    %0 = vector.load %arg1[%c0, %c0_0] : memref<8x128xf32, #tpu.memory_space<vmem>>, vector<8x128xf32>
    %1 = arith.mulf %0, %0 : vector<8x128xf32>
    %cst = arith.constant dense<0.000000e+00> : vector<8xf32>
    %2 = vector.multi_reduction <add>, %1, %cst [1] : vector<8x128xf32> to vector<8xf32>
    %3 = vector.shape_cast %2 : vector<8xf32> to vector<8x1xf32>
    %cst_1 = arith.constant 1.000000e-24 : f32
    %4 = vector.broadcast %cst_1 : f32 to vector<8x1xf32>
    %5 = arith.maximumf %3, %4 : vector<8x1xf32>
    %6 = math.rsqrt %5 : vector<8x1xf32>
    %7 = vector.broadcast %6 : vector<8x1xf32> to vector<8x128xf32>
    %8 = arith.mulf %0, %7 : vector<8x128xf32>
    %c0_2 = arith.constant 0 : index
    %c0_3 = arith.constant 0 : index
    %c0_4 = arith.constant 0 : index
    %9 = vector.load %arg2[%c0_2, %c0_3, %c0_4] : memref<2x128x128xf32, #tpu.memory_space<vmem>>, vector<1x128x128xf32>
    %10 = vector.shape_cast %9 : vector<1x128x128xf32> to vector<128x128xf32>
    %cst_5 = arith.constant dense<0.000000e+00> : vector<8x128xf32>
    %11 = tpu.matmul %8, %10, %cst_5 {dimension_numbers = #tpu.dot_dimension_numbers<[1], [0], [0], [1], [0, 0, 1, 1], [], []>} : vector<8x128xf32>, vector<128x128xf32>, vector<8x128xf32> -> vector<8x128xf32>
    %c0_6 = arith.constant 0 : index
    %c0_7 = arith.constant 0 : index
    %c0_8 = arith.constant 0 : index
    %12 = vector.load %arg3[%c0_6, %c0_7, %c0_8] : memref<2x1x128xf32, #tpu.memory_space<vmem>>, vector<1x1x128xf32>
    %13 = vector.shape_cast %12 : vector<1x1x128xf32> to vector<1x128xf32>
    %14 = vector.broadcast %13 : vector<1x128xf32> to vector<8x128xf32>
    %15 = arith.addf %11, %14 : vector<8x128xf32>
    %cst_9 = arith.constant 0.000000e+00 : f32
    %16 = vector.broadcast %cst_9 : f32 to vector<8x128xf32>
    %17 = arith.maximumf %15, %16 : vector<8x128xf32>
    %18 = arith.mulf %17, %17 : vector<8x128xf32>
    %cst_10 = arith.constant dense<0.000000e+00> : vector<8xf32>
    %19 = vector.multi_reduction <add>, %18, %cst_10 [1] : vector<8x128xf32> to vector<8xf32>
    %20 = vector.shape_cast %19 : vector<8xf32> to vector<8x1xf32>
    %cst_11 = arith.constant 1.000000e-24 : f32
    %21 = vector.broadcast %cst_11 : f32 to vector<8x1xf32>
    %22 = arith.maximumf %20, %21 : vector<8x1xf32>
    %23 = math.rsqrt %22 : vector<8x1xf32>
    %24 = vector.broadcast %23 : vector<8x1xf32> to vector<8x128xf32>
    %25 = arith.mulf %17, %24 : vector<8x128xf32>
    %c1 = arith.constant 1 : index
    %c0_12 = arith.constant 0 : index
    %c0_13 = arith.constant 0 : index
    %26 = vector.load %arg2[%c1, %c0_12, %c0_13] : memref<2x128x128xf32, #tpu.memory_space<vmem>>, vector<1x128x128xf32>
    %27 = vector.shape_cast %26 : vector<1x128x128xf32> to vector<128x128xf32>
    %cst_14 = arith.constant dense<0.000000e+00> : vector<8x128xf32>
    %28 = tpu.matmul %25, %27, %cst_14 {dimension_numbers = #tpu.dot_dimension_numbers<[1], [0], [0], [1], [0, 0, 1, 1], [], []>} : vector<8x128xf32>, vector<128x128xf32>, vector<8x128xf32> -> vector<8x128xf32>
    %c1_15 = arith.constant 1 : index
    %c0_16 = arith.constant 0 : index
    %c0_17 = arith.constant 0 : index
    %29 = vector.load %arg3[%c1_15, %c0_16, %c0_17] : memref<2x1x128xf32, #tpu.memory_space<vmem>>, vector<1x1x128xf32>
    %30 = vector.shape_cast %29 : vector<1x1x128xf32> to vector<1x128xf32>
    %31 = vector.broadcast %30 : vector<1x128xf32> to vector<8x128xf32>
    %32 = arith.addf %28, %31 : vector<8x128xf32>
    %cst_18 = arith.constant 0.000000e+00 : f32
    %33 = vector.broadcast %cst_18 : f32 to vector<8x128xf32>
    %34 = arith.maximumf %32, %33 : vector<8x128xf32>
    %c0_19 = arith.constant 0 : index
    %c0_20 = arith.constant 0 : index
    %35 = vector.load %arg4[%c0_19, %c0_20] : memref<8x128xf32, #tpu.memory_space<vmem>>, vector<8x128xf32>
    tpu.vector_store %arg4[%c0_19, %c0_20], %34 {strides = array<i32>} : memref<8x128xf32, #tpu.memory_space<vmem>>, vector<8x128xf32>,
    return
  }
  func.func @transform_0(%arg0: i32) -> (i32, i32) {
    %c0_i32 = arith.constant 0 : i32
    %c0_i32_0 = arith.constant 0 : i32
    return %arg0, %c0_i32 : i32, i32
  }
  func.func @transform_1(%arg0: i32) -> (i32, i32, i32) {
    %c0_i32 = arith.constant 0 : i32
    %c0_i32_0 = arith.constant 0 : i32
    %c0_i32_1 = arith.constant 0 : i32
    %c0_i32_2 = arith.constant 0 : i32
    return %c0_i32, %c0_i32_0, %c0_i32_1 : i32, i32, i32
  }
  func.func @transform_2(%arg0: i32) -> (i32, i32, i32) {
    %c0_i32 = arith.constant 0 : i32
    %c0_i32_0 = arith.constant 0 : i32
    %c0_i32_1 = arith.constant 0 : i32
    %c0_i32_2 = arith.constant 0 : i32
    return %c0_i32, %c0_i32_0, %c0_i32_1 : i32, i32, i32
  }
  func.func @transform_3(%arg0: i32) -> (i32, i32) {
    %c0_i32 = arith.constant 0 : i32
    %c0_i32_0 = arith.constant 0 : i32
    return %arg0, %c0_i32 : i32, i32
  }
}

</mosaic_0001>

<bundles_post_ra>
// kernel: tpu_custom_call.1
= control target key start
LH: loop header
LB: loop body
LE: loop exit
PB: predicated region body
PF: predicated region fallthrough
CT: control target
= control target key end

     0   :  { %8 = vsyncpa [#allocation3], 0  ;;  %s350_s0 = inlined_call_operand.hbm [shape: f32[8,128], index: 0, kind: input, shape index: {}]   ;;  %s351_s1 = inlined_call_operand.hbm [shape: f32[2,128,128], index: 1, kind: input, shape index: {}]   ;;  %s352_s2 = inlined_call_operand.hbm [shape: f32[2,1,128], index: 2, kind: input, shape index: {}]   ;;  %s353_s3 = inlined_call_operand.hbm [shape: f32[8,128], index: 3, kind: output, shape index: {}]  }
   0x1   :  { %9 = vsyncpa [#allocation6], 0  ;;  %s26_s14 = sshll.u32 %s351_s1, 4  ;;  %s27_s14 = int_to_ptr.hbm [resolvable:$true] %s26_s14 }
   0x2   :  { %10 = vsyncpa [#allocation4], 0  ;;  %s310_s15 = smov [#allocation5]   ;;  %s16_s19 = sshll.u32 %s350_s0, 4  ;;  %s17_s19 = int_to_ptr.hbm [resolvable:$true] %s16_s19 }
   0x3   :  { %s28_s16 = sshll.u32 %s310_s15, 4  ;;  %s311_s20 = smov 128   ;;  %s29_s16 = int_to_ptr.vmem [resolvable:$true] %s28_s16 }
   0x4   :  { %s312_s21 = smov 8   ;;  %s313_s22 = smov [#allocation2]  }
   0x5   :  { %34 = dma.hbm_to_vmem [thread:$0]  %s27_s14, 4096, %s29_s16, [#allocation6], %s311_s20, %s311_s20, %s312_s21  }
   0x6   :  { %s18_s23 = sshll.u32 %s313_s22, 4  ;;  %s39_s26 = sshll.u32 %s352_s2, 4  ;;  %s19_s23 = int_to_ptr.vmem [resolvable:$true] %s18_s23  ;;  %s40_s26 = int_to_ptr.hbm [resolvable:$true] %s39_s26 }
   0x7   :  { %21 = dma.hbm_to_vmem [thread:$0]  %s17_s19, 128, %s19_s23, [#allocation3]  }
   0x8   :  { %s314_s1 = smov [#allocation7]   ;;  %s315_s28 = smov 16  }
   0x9   :  { %s41_s27 = sshll.u32 %s314_s1, 4  ;;  %s316_s29 = smov 1   ;;  %s42_s27 = int_to_ptr.vmem [resolvable:$true] %s41_s27 }
   0xa   :  { %47 = dma.hbm_to_vmem [thread:$0]  %s40_s26, 32, %s42_s27, [#allocation6], %s315_s28, %s315_s28, %s316_s29  }
   0xb   :  { %304 = dma.done.wait [#allocation3], 128  }
   0xc   :  { %305 = vsyncadd [#allocation3], 4294967168 }
   0xd   :  { %306 = dma.done.wait [#allocation6], 4128  }
   0xe   :  { %307 = vsyncadd [#allocation6], 4294963168  ;;  %v60_v0 = vld [vmem:[#allocation2] sm:$0xff]  ;;  %v90_v2 = vld [vmem:[#allocation5 + $0x70] sm:$0xff]  ;;  %s317_s0 = smov [#allocation8]   ;;  %s183_s5 = sshll.u32 %s353_s3, 4  ;;  %s184_s5 = int_to_ptr.hbm [resolvable:$true] %s183_s5 }
   0xf   :  { %v91_v1 = vld [vmem:[#allocation5 + $0x78] sm:$0xff]  ;;  %v61_v3 = vmul.f32 %v60_v0, %v60_v0  ;;  %v89_v4 = vld [vmem:[#allocation5 + $0x68] sm:$0xff]  ;;  %v88_v5 = vld [vmem:[#allocation5 + $0x60] sm:$0xff]  ;;  %s181_s2 = sshll.u32 %s317_s0, 4  ;;  %s182_s2 = int_to_ptr.vmem [resolvable:$true] %s181_s2 }
  0x10   :  { %96 = vmatpush.msra.mxu0 %v91_v1  ;;  %v87_v6 = vld [vmem:[#allocation5 + $0x58] sm:$0xff]  ;;  %v86_v7 = vld [vmem:[#allocation5 + $0x50] sm:$0xff]  ;;  %v85_v8 = vld [vmem:[#allocation5 + $0x48] sm:$0xff] }
  0x11   :  { %62 = vadd.xlane.f32.xlu0 %v61_v3  ;;  %v84_v9 = vld [vmem:[#allocation5 + $0x40] sm:$0xff]  ;;  %v83_v10 = vld [vmem:[#allocation5 + $0x38] sm:$0xff]  ;;  %v82_v11 = vld [vmem:[#allocation5 + $0x30] sm:$0xff] }
  0x12   :  { %97 = vmatpush.msra.mxu0 %v90_v2  ;;  %v81_v12 = vld [vmem:[#allocation5 + $0x28] sm:$0xff]  ;;  %v80_v13 = vld [vmem:[#allocation5 + $0x20] sm:$0xff]  ;;  %v79_v14 = vld [vmem:[#allocation5 + $0x18] sm:$0xff] }
  0x13   :  { %v78_v15 = vld [vmem:[#allocation5 + $0x10] sm:$0xff]  ;;  %v77_v16 = vld [vmem:[#allocation5 + $0x8] sm:$0xff]  ;;  %v76_v17 = vld [vmem:[#allocation5] sm:$0xff] }
  0x14   :  { %98 = vmatpush.msra.mxu0 %v89_v4  ;;  %v148_v28 = vld [vmem:[#allocation5 + $0xf8] sm:$0xff]  ;;  %v147_v29 = vld [vmem:[#allocation5 + $0xf0] sm:$0xff]  ;;  %v146_v30 = vld [vmem:[#allocation5 + $0xe8] sm:$0xff] }
  0x15   :  { %154 = vmatpush.msra.mxu1 %v148_v28  ;;  %v145_v31 = vld [vmem:[#allocation5 + $0xe0] sm:$0xff]  ;;  %v144_v32 = vld [vmem:[#allocation5 + $0xd8] sm:$0xff]  ;;  %v143_v38 = vld [vmem:[#allocation5 + $0xd0] sm:$0xff] }
  0x16   :  { %99 = vmatpush.msra.mxu0 %v88_v5  ;;  %v202_v33 = vld [vmem:[#allocation7] ss:$0 sm:$0xff]  ;;  %v142_v39 = vld [vmem:[#allocation5 + $0xc8] sm:$0xff]  ;;  %v140_v41 = vld [vmem:[#allocation5 + $0xb8] sm:$0xff] }
  0x17   :  { %155 = vmatpush.msra.mxu1 %v147_v29  ;;  %v141_v40 = vld [vmem:[#allocation5 + $0xc0] sm:$0xff]  ;;  %v139_v42 = vld [vmem:[#allocation5 + $0xb0] sm:$0xff]  ;;  %v138_v43 = vld [vmem:[#allocation5 + $0xa8] sm:$0xff] }
  0x18   :  { %100 = vmatpush.msra.mxu0 %v87_v6  ;;  %v137_v44 = vld [vmem:[#allocation5 + $0xa0] sm:$0xff]  ;;  %v136_v45 = vld [vmem:[#allocation5 + $0x98] sm:$0xff]  ;;  %v135_v46 = vld [vmem:[#allocation5 + $0x90] sm:$0xff] }
  0x19   :  { %156 = vmatpush.msra.mxu1 %v146_v30  ;;  %v134_v47 = vld [vmem:[#allocation5 + $0x88] sm:$0xff]  ;;  %v133_v48 = vld [vmem:[#allocation5 + $0x80] sm:$0xff] }
  0x1a   :  { %101 = vmatpush.msra.mxu0 %v86_v7  ;;  %v203_v59 = vld [vmem:[#allocation7 + $0x1] ss:$0 sm:$0xff] }
  0x1b   :  { %157 = vmatpush.msra.mxu1 %v145_v31 }
  0x1c   :  { %102 = vmatpush.msra.mxu0 %v85_v8 }
  0x1d   :  { %158 = vmatpush.msra.mxu1 %v144_v32 }
  0x1e   :  { %103 = vmatpush.msra.mxu0 %v84_v9 }
  0x1f   :  { %159 = vmatpush.msra.mxu1 %v143_v38 }
  0x20   :  { %104 = vmatpush.msra.mxu0 %v83_v10 }
  0x21   :  { %160 = vmatpush.msra.mxu1 %v142_v39 }
  0x22   :  { %105 = vmatpush.msra.mxu0 %v82_v11 }
  0x23   :  { %161 = vmatpush.msra.mxu1 %v141_v40 }
  0x24   :  { %106 = vmatpush.msra.mxu0 %v81_v12 }
  0x25   :  { %162 = vmatpush.msra.mxu1 %v140_v41 }
  0x26   :  { %107 = vmatpush.msra.mxu0 %v80_v13 }
  0x27   :  { %163 = vmatpush.msra.mxu1 %v139_v42 }
  0x28   :  { %108 = vmatpush.msra.mxu0 %v79_v14 }
  0x29   :  { %164 = vmatpush.msra.mxu1 %v138_v43 }
  0x2a   :  { %109 = vmatpush.msra.mxu0 %v78_v15 }
  0x2b   :  { %165 = vmatpush.msra.mxu1 %v137_v44 }
  0x2c   :  { %110 = vmatpush.msra.mxu0 %v77_v16 }
  0x2d   :  { %166 = vmatpush.msra.mxu1 %v136_v45 }
  0x2e   :  { %111 = vmatpush.msra.mxu0 %v76_v17 }
  0x2f   :  { %167 = vmatpush.msra.mxu1 %v135_v46 }
  0x31   :  { %168 = vmatpush.msra.mxu1 %v134_v47 }
  0x33   :  { %169 = vmatpush.msra.mxu1 %v133_v48 }
  0x84   :  { %v63_v18 = vpop.xlane.xlu0 %62 }
  0x85   :  { %v64_v19 = vmax.f32 %v63_v18, 1e-24 }
  0x87   :  { %204 = vrsqrt.f32 %v64_v19  ;;  %vm71_vm1 = vweird.f32 %v64_v19 }
  0x8d   :  { %v205_v20 = vpop.eup %204 }
  0x8e   :  { %v66_v21 = vmul.f32 %v205_v20, %v64_v19  ;;  %vm72_vm0 = vweird.f32 %v205_v20 }
  0x8f   :  { %vm73_vm2 = vmor %vm71_vm1, %vm72_vm0 }
  0x90   :  { %v67_v22 = vmul.f32 %v205_v20, %v66_v21 }
  0x92   :  { %v68_v23 = vmul.f32 0.5, %v67_v22 }
  0x94   :  { %v69_v24 = vsub.f32 1.5, %v68_v23 }
  0x96   :  { %v70_v25 = vmul.f32 %v205_v20, %v69_v24 }
  0x98   :  { %v74_v26 = vsel %vm73_vm2, %v205_v20, %v70_v25 }
  0x99   :  { %v75_v27 = vmul.f32 %v74_v26, %v60_v0 }
  0x9b   :  { %112 = vmatmul.f32.vlgmr.msra.gmra.mxu0 %v75_v27 }
 0x118   :  { %v113_v34 = vpop.f32.mrf.mxu0 }
 0x119   :  { %v114_v35 = vadd.f32 %v202_v33, %v113_v34 }
 0x11b   :  { %v116_v36 = vmax.f32 %v114_v35, 0.0 }
 0x11d   :  { %v117_v37 = vmul.f32 %v116_v36, %v116_v36 }
 0x11f   :  { %118 = vadd.xlane.f32.xlu0 %v117_v37 }
 0x192   :  { %v119_v49 = vpop.xlane.xlu0 %118 }
 0x193   :  { %v120_v50 = vmax.f32 %v119_v49, 1e-24 }
 0x195   :  { %206 = vrsqrt.f32 %v120_v50  ;;  %vm127_vm4 = vweird.f32 %v120_v50 }
 0x19b   :  { %v207_v51 = vpop.eup %206 }
 0x19c   :  { %v122_v52 = vmul.f32 %v207_v51, %v120_v50  ;;  %vm128_vm3 = vweird.f32 %v207_v51 }
 0x19d   :  { %vm129_vm5 = vmor %vm127_vm4, %vm128_vm3 }
 0x19e   :  { %v123_v53 = vmul.f32 %v207_v51, %v122_v52 }
 0x1a0   :  { %v124_v54 = vmul.f32 0.5, %v123_v53 }
 0x1a2   :  { %v125_v55 = vsub.f32 1.5, %v124_v54 }
 0x1a4   :  { %v126_v56 = vmul.f32 %v207_v51, %v125_v55 }
 0x1a6   :  { %v130_v57 = vsel %vm129_vm5, %v207_v51, %v126_v56 }
 0x1a7   :  { %v131_v58 = vmul.f32 %v130_v57, %v116_v36 }
 0x1a9   :  { %170 = vmatmul.f32.vlgmr.msra.gmra.mxu1 %v131_v58 }
 0x226   :  { %v171_v60 = vpop.f32.mrf.mxu1 }
 0x227   :  { %v172_v61 = vadd.f32 %v203_v59, %v171_v60 }
 0x229   :  { %v174_v62 = vmax.f32 %v172_v61, 0.0 }
 0x22b   :  { %175 = vst [vmem:[#allocation8] sm:$0xff] %v174_v62 }
 0x22c   :  { %186 = dma.vmem_to_hbm [thread:$0]  %s182_s2, 128, %s184_s5, [#allocation4]  }
 0x22d   :  { %308 = dma.done.wait [#allocation4], 128  }
 0x22e   :  { %309 = vsyncadd [#allocation4], 4294967168 }
 0x22f   :  { %191 = vsyncpa [#allocation3], 1 }
 0x230   :  { %192 = vsyncpa [#allocation6], 1 }
 0x231   :  { %193 = vsyncpa [#allocation4], 1 }

</bundles_post_ra>
